<compile_context>
chip_gen: v5e
topology: v5e:2x2
jax: 0.10.0
libtpu: 0.0.40
codegen_flags: <defaults>
</compile_context>

<pallas_src>
from functools import partial

import numpy as np
import jax
import jax.numpy as jnp
from jax.experimental import pallas as pl
from jax.experimental.pallas import tpu as pltpu


# ----------------------------------------------------------------------------
# Fused Pallas kernel: one image (H rows of W*C lanes) per grid step.
# ----------------------------------------------------------------------------
def residual_block_kernel(x_ref, wb1_ref, b1_ref, wb2_ref, b2_ref, a_ref,
                          o_ref, *, H):
    x = x_ref[...]                       # (H, W*C) lane-dense activation slab
    alpha = a_ref[0, 0]                  # PReLU slope (scalar from SMEM)

    def conv3x3(acts, wb_ref, b_ref):
        # Row-shifted, reflection-corrected views of the slab (sublane axis):
        #   top[h] = acts[refl(h-1)],  bot[h] = acts[refl(h+1)]
        top = jnp.concatenate([acts[1:2], acts[:H - 1]], axis=0)
        bot = jnp.concatenate([acts[1:H], acts[H - 2:H - 1]], axis=0)
        # Three lane-dense (H,128)x(128,128) MXU matmuls, f32 accumulate.
        y = jnp.dot(top, wb_ref[0], preferred_element_type=jnp.float32)
        y = y + jnp.dot(acts, wb_ref[1], preferred_element_type=jnp.float32)
        y = y + jnp.dot(bot, wb_ref[2], preferred_element_type=jnp.float32)
        return y + b_ref[...]            # (1, W*C) lane-aligned bias broadcast

    h = conv3x3(x, wb1_ref, b1_ref)                      # conv1
    h = jnp.where(h >= 0.0, h, alpha * h)                # PReLU (shared slope)
    h = conv3x3(h, wb2_ref, b2_ref)                      # conv2
    o_ref[...] = h + x                                   # residual add, store


# ----------------------------------------------------------------------------
# Band-weight construction: fold kw taps + cin->cout mixing + width reflection
# of a 3x3 HWIO weight into K matrices of shape (W*C, W*C).
# ----------------------------------------------------------------------------
def make_band_weights(w_hwio, W, C):
    w = np.asarray(jax.device_get(w_hwio), dtype=np.float32)   # (K, K, C, C)
    K = w.shape[0]
    pad = K // 2
    WC = W * C
    bands = np.zeros((K, WC, WC), np.float32)
    for kh in range(K):
        for kw in range(K):
            for wo in range(W):
                ws = wo + kw - pad
                if ws < 0:                      # ReflectionPad2d: -1 -> 1
                    ws = -ws
                elif ws >= W:                   # W -> W-2
                    ws = 2 * W - 2 - ws
                bands[kh, ws * C:(ws + 1) * C, wo * C:(wo + 1) * C] += w[kh, kw]
    return jnp.asarray(bands)                   # (K, W*C, W*C)


# ----------------------------------------------------------------------------
# Wrapper
# ----------------------------------------------------------------------------
def residual_block_forward(x_nhwc, p):
    """x_nhwc: (N,H,W,C) f32 -> (N,H,W,C) f32."""
    N, H, W, C = x_nhwc.shape
    K = 3
    WC = W * C
    # Lane-dense packing assumptions (see perf review): W*C multiple of 128,
    # H multiple of 8 (sublane tiling), spatial >= 2 for reflection pad.
    assert WC % 128 == 0 and H % 8 == 0 and H >= 2 and W >= 2

    # Free reshape (same row-major element order): (N,H,W,C) -> (N*H, W*C).
    x_slab = x_nhwc.reshape(N * H, WC)

    wb1 = make_band_weights(p['w1'], W, C)                    # (K, WC, WC)
    wb2 = make_band_weights(p['w2'], W, C)                    # (K, WC, WC)
    b1 = jnp.tile(p['b1'].reshape(1, C), (1, W))              # (1, WC)
    b2 = jnp.tile(p['b2'].reshape(1, C), (1, W))              # (1, WC)
    alpha = p['prelu'].reshape(1, 1).astype(jnp.float32)      # SMEM scalar

    kernel = partial(residual_block_kernel, H=H)
    out = pl.pallas_call(
        kernel,
        out_shape=jax.ShapeDtypeStruct((N * H, WC), jnp.float32),
        grid=(N,),                                            # one image / step
        in_specs=[
            pl.BlockSpec((H, WC), lambda n: (n, 0)),          # x slab (per image)
            pl.BlockSpec((K, WC, WC), lambda n: (0, 0, 0)),   # conv1 band weights
            pl.BlockSpec((1, WC), lambda n: (0, 0)),          # conv1 bias
            pl.BlockSpec((K, WC, WC), lambda n: (0, 0, 0)),   # conv2 band weights
            pl.BlockSpec((1, WC), lambda n: (0, 0)),          # conv2 bias
            pl.BlockSpec(memory_space=pltpu.MemorySpace.SMEM),  # PReLU slope
        ],
        out_specs=pl.BlockSpec((H, WC), lambda n: (n, 0)),
        compiler_params=pltpu.CompilerParams(
            dimension_semantics=("parallel",)),               # v7x: 2 TCs
    )(x_slab, wb1, b1, wb2, b2, alpha)
    return out.reshape(N, H, W, C)   # free: identical row-major order


# ----------------------------------------------------------------------------
# Pure-JAX reference for correctness
# ----------------------------------------------------------------------------
def ref_forward(x, p):
    def conv(inp, w, b):
        xp = jnp.pad(inp, ((0, 0), (1, 1), (1, 1), (0, 0)), mode='reflect')
        y = jax.lax.conv_general_dilated(
            xp, w, window_strides=(1, 1), padding='VALID',
            dimension_numbers=('NHWC', 'HWIO', 'NHWC'))
        return y + b.reshape(1, 1, 1, -1)

    a = p['prelu'][0, 0]
    h = conv(x, p['w1'], p['b1'])
    h = jnp.where(h >= 0, h, a * h)                 # PReLU
    h = conv(h, p['w2'], p['b2'])
    return h + x


# ----------------------------------------------------------------------------
# Parameter construction (deterministic, synthetic)
# ----------------------------------------------------------------------------
def make_params(key, C, K=3):
    ks = jax.random.split(key, 4)
    rnd = lambda k, shape, s=0.1: (s * jax.random.normal(k, shape)).astype(jnp.float32)
    return {
        'w1': rnd(ks[0], (K, K, C, C)),             # HWIO
        'b1': rnd(ks[1], (1, C)),
        'w2': rnd(ks[2], (K, K, C, C)),
        'b2': rnd(ks[3], (1, C)),
        'prelu': jnp.full((1, 1), 0.25, jnp.float32),  # nn.PReLU() default init
    }


# ----------------------------------------------------------------------------
if __name__ == "__main__":
    # ResidualBlock(channels=8): N=2, C=8, H=W=16  ->  W*C = 128 (lane-dense).
    N, C, H, W = 2, 8, 16, 16

    key = jax.random.PRNGKey(0)
    kx, kp = jax.random.split(key)
    x_nchw = jax.random.normal(kx, (N, C, H, W), dtype=jnp.float32)  # PyTorch-style
    params = make_params(kp, C)

    # NCHW -> NHWC at the wrapper boundary (kernel works in NHWC-derived slab).
    x_nhwc = jnp.transpose(x_nchw, (0, 2, 3, 1))

    out_nhwc = jax.block_until_ready(residual_block_forward(x_nhwc, params))
    out_nchw = jnp.transpose(out_nhwc, (0, 3, 1, 2))

    ref_nhwc = ref_forward(x_nhwc, params)
    assert out_nchw.shape == (N, C, H, W)
    max_err = float(jnp.max(jnp.abs(out_nhwc - ref_nhwc)))
    assert jnp.allclose(out_nhwc, ref_nhwc, rtol=1e-4, atol=1e-4), max_err

    print("KERNEL_OK")
</pallas_src>

<mosaic_0001>
module attributes {stable_mosaic.version = 11 : i64} {
  func.func @residual_block_kernel(%arg0: i32, %arg1: memref<16x128xf32, #tpu.memory_space<vmem>>, %arg2: memref<3x128x128xf32, #tpu.memory_space<vmem>>, %arg3: memref<1x128xf32, #tpu.memory_space<vmem>>, %arg4: memref<3x128x128xf32, #tpu.memory_space<vmem>>, %arg5: memref<1x128xf32, #tpu.memory_space<vmem>>, %arg6: memref<1x1xf32, #tpu.memory_space<smem>>, %arg7: memref<16x128xf32, #tpu.memory_space<vmem>>) attributes {dimension_semantics = [#tpu.dimension_semantics<parallel>], iteration_bounds = array<i64: 2>, scalar_prefetch = 0 : i64, scratch_operands = 0 : i64, tpu.core_type = #tpu.core_type<tc>, window_params = [{transform_indices = @transform_0, window_bounds = array<i64: 16, 128>}, {pipeline_mode = #tpu.pipeline_mode<synchronous>, transform_indices = @transform_1, window_bounds = array<i64: 3, 128, 128>}, {pipeline_mode = #tpu.pipeline_mode<synchronous>, transform_indices = @transform_2, window_bounds = array<i64: 1, 128>}, {pipeline_mode = #tpu.pipeline_mode<synchronous>, transform_indices = @transform_3, window_bounds = array<i64: 3, 128, 128>}, {pipeline_mode = #tpu.pipeline_mode<synchronous>, transform_indices = @transform_4, window_bounds = array<i64: 1, 128>}, {transform_indices = @transform_5, window_bounds = array<i64: 1, 1>}, {transform_indices = @transform_6, window_bounds = array<i64: 16, 128>}]} {
    %c0 = arith.constant 0 : index
    %c0_0 = arith.constant 0 : index
    %0 = vector.load %arg1[%c0, %c0_0] : memref<16x128xf32, #tpu.memory_space<vmem>>, vector<16x128xf32>
    %c0_1 = arith.constant 0 : index
    %c0_2 = arith.constant 0 : index
    %1 = memref.load %arg6[%c0_1, %c0_2] : memref<1x1xf32, #tpu.memory_space<smem>>
    %2 = vector.extract_strided_slice %0 {offsets = [1, 0], sizes = [1, 128], strides = [1, 1]} : vector<16x128xf32> to vector<1x128xf32>
    %3 = vector.extract_strided_slice %0 {offsets = [0, 0], sizes = [15, 128], strides = [1, 1]} : vector<16x128xf32> to vector<15x128xf32>
    %4 = tpu.concatenate %2, %3 in 0 : vector<1x128xf32>, vector<15x128xf32> -> vector<16x128xf32>
    %5 = vector.extract_strided_slice %0 {offsets = [1, 0], sizes = [15, 128], strides = [1, 1]} : vector<16x128xf32> to vector<15x128xf32>
    %6 = vector.extract_strided_slice %0 {offsets = [14, 0], sizes = [1, 128], strides = [1, 1]} : vector<16x128xf32> to vector<1x128xf32>
    %7 = tpu.concatenate %5, %6 in 0 : vector<15x128xf32>, vector<1x128xf32> -> vector<16x128xf32>
    %c0_3 = arith.constant 0 : index
    %c0_4 = arith.constant 0 : index
    %c0_5 = arith.constant 0 : index
    %8 = vector.load %arg2[%c0_3, %c0_4, %c0_5] : memref<3x128x128xf32, #tpu.memory_space<vmem>>, vector<1x128x128xf32>
    %9 = vector.shape_cast %8 : vector<1x128x128xf32> to vector<128x128xf32>
    %cst = arith.constant dense<0.000000e+00> : vector<16x128xf32>
    %10 = tpu.matmul %4, %9, %cst {dimension_numbers = #tpu.dot_dimension_numbers<[1], [0], [0], [1], [0, 0, 1, 1], [], []>} : vector<16x128xf32>, vector<128x128xf32>, vector<16x128xf32> -> vector<16x128xf32>
    %c1 = arith.constant 1 : index
    %c0_6 = arith.constant 0 : index
    %c0_7 = arith.constant 0 : index
    %11 = vector.load %arg2[%c1, %c0_6, %c0_7] : memref<3x128x128xf32, #tpu.memory_space<vmem>>, vector<1x128x128xf32>
    %12 = vector.shape_cast %11 : vector<1x128x128xf32> to vector<128x128xf32>
    %cst_8 = arith.constant dense<0.000000e+00> : vector<16x128xf32>
    %13 = tpu.matmul %0, %12, %cst_8 {dimension_numbers = #tpu.dot_dimension_numbers<[1], [0], [0], [1], [0, 0, 1, 1], [], []>} : vector<16x128xf32>, vector<128x128xf32>, vector<16x128xf32> -> vector<16x128xf32>
    %14 = arith.addf %10, %13 : vector<16x128xf32>
    %c2 = arith.constant 2 : index
    %c0_9 = arith.constant 0 : index
    %c0_10 = arith.constant 0 : index
    %15 = vector.load %arg2[%c2, %c0_9, %c0_10] : memref<3x128x128xf32, #tpu.memory_space<vmem>>, vector<1x128x128xf32>
    %16 = vector.shape_cast %15 : vector<1x128x128xf32> to vector<128x128xf32>
    %cst_11 = arith.constant dense<0.000000e+00> : vector<16x128xf32>
    %17 = tpu.matmul %7, %16, %cst_11 {dimension_numbers = #tpu.dot_dimension_numbers<[1], [0], [0], [1], [0, 0, 1, 1], [], []>} : vector<16x128xf32>, vector<128x128xf32>, vector<16x128xf32> -> vector<16x128xf32>
    %18 = arith.addf %14, %17 : vector<16x128xf32>
    %c0_12 = arith.constant 0 : index
    %c0_13 = arith.constant 0 : index
    %19 = vector.load %arg3[%c0_12, %c0_13] : memref<1x128xf32, #tpu.memory_space<vmem>>, vector<1x128xf32>
    %20 = vector.broadcast %19 : vector<1x128xf32> to vector<16x128xf32>
    %21 = arith.addf %18, %20 : vector<16x128xf32>
    %cst_14 = arith.constant 0.000000e+00 : f32
    %22 = vector.broadcast %cst_14 : f32 to vector<16x128xf32>
    %23 = arith.cmpf oge, %21, %22 : vector<16x128xf32>
    %24 = vector.broadcast %1 : f32 to vector<16x128xf32>
    %25 = arith.mulf %24, %21 : vector<16x128xf32>
    %26 = arith.select %23, %21, %25 : vector<16x128xi1>, vector<16x128xf32>
    %27 = vector.extract_strided_slice %26 {offsets = [1, 0], sizes = [1, 128], strides = [1, 1]} : vector<16x128xf32> to vector<1x128xf32>
    %28 = vector.extract_strided_slice %26 {offsets = [0, 0], sizes = [15, 128], strides = [1, 1]} : vector<16x128xf32> to vector<15x128xf32>
    %29 = tpu.concatenate %27, %28 in 0 : vector<1x128xf32>, vector<15x128xf32> -> vector<16x128xf32>
    %30 = vector.extract_strided_slice %26 {offsets = [1, 0], sizes = [15, 128], strides = [1, 1]} : vector<16x128xf32> to vector<15x128xf32>
    %31 = vector.extract_strided_slice %26 {offsets = [14, 0], sizes = [1, 128], strides = [1, 1]} : vector<16x128xf32> to vector<1x128xf32>
    %32 = tpu.concatenate %30, %31 in 0 : vector<15x128xf32>, vector<1x128xf32> -> vector<16x128xf32>
    %c0_15 = arith.constant 0 : index
    %c0_16 = arith.constant 0 : index
    %c0_17 = arith.constant 0 : index
    %33 = vector.load %arg4[%c0_15, %c0_16, %c0_17] : memref<3x128x128xf32, #tpu.memory_space<vmem>>, vector<1x128x128xf32>
    %34 = vector.shape_cast %33 : vector<1x128x128xf32> to vector<128x128xf32>
    %cst_18 = arith.constant dense<0.000000e+00> : vector<16x128xf32>
    %35 = tpu.matmul %29, %34, %cst_18 {dimension_numbers = #tpu.dot_dimension_numbers<[1], [0], [0], [1], [0, 0, 1, 1], [], []>} : vector<16x128xf32>, vector<128x128xf32>, vector<16x128xf32> -> vector<16x128xf32>
    %c1_19 = arith.constant 1 : index
    %c0_20 = arith.constant 0 : index
    %c0_21 = arith.constant 0 : index
    %36 = vector.load %arg4[%c1_19, %c0_20, %c0_21] : memref<3x128x128xf32, #tpu.memory_space<vmem>>, vector<1x128x128xf32>
    %37 = vector.shape_cast %36 : vector<1x128x128xf32> to vector<128x128xf32>
    %cst_22 = arith.constant dense<0.000000e+00> : vector<16x128xf32>
    %38 = tpu.matmul %26, %37, %cst_22 {dimension_numbers = #tpu.dot_dimension_numbers<[1], [0], [0], [1], [0, 0, 1, 1], [], []>} : vector<16x128xf32>, vector<128x128xf32>, vector<16x128xf32> -> vector<16x128xf32>
    %39 = arith.addf %35, %38 : vector<16x128xf32>
    %c2_23 = arith.constant 2 : index
    %c0_24 = arith.constant 0 : index
    %c0_25 = arith.constant 0 : index
    %40 = vector.load %arg4[%c2_23, %c0_24, %c0_25] : memref<3x128x128xf32, #tpu.memory_space<vmem>>, vector<1x128x128xf32>
    %41 = vector.shape_cast %40 : vector<1x128x128xf32> to vector<128x128xf32>
    %cst_26 = arith.constant dense<0.000000e+00> : vector<16x128xf32>
    %42 = tpu.matmul %32, %41, %cst_26 {dimension_numbers = #tpu.dot_dimension_numbers<[1], [0], [0], [1], [0, 0, 1, 1], [], []>} : vector<16x128xf32>, vector<128x128xf32>, vector<16x128xf32> -> vector<16x128xf32>
    %43 = arith.addf %39, %42 : vector<16x128xf32>
    %c0_27 = arith.constant 0 : index
    %c0_28 = arith.constant 0 : index
    %44 = vector.load %arg5[%c0_27, %c0_28] : memref<1x128xf32, #tpu.memory_space<vmem>>, vector<1x128xf32>
    %45 = vector.broadcast %44 : vector<1x128xf32> to vector<16x128xf32>
    %46 = arith.addf %43, %45 : vector<16x128xf32>
    %47 = arith.addf %46, %0 : vector<16x128xf32>
    %c0_29 = arith.constant 0 : index
    %c0_30 = arith.constant 0 : index
    %48 = vector.load %arg7[%c0_29, %c0_30] : memref<16x128xf32, #tpu.memory_space<vmem>>, vector<16x128xf32>
    tpu.vector_store %arg7[%c0_29, %c0_30], %47 {strides = array<i32>} : memref<16x128xf32, #tpu.memory_space<vmem>>, vector<16x128xf32>,
    return
  }
  func.func @transform_0(%arg0: i32) -> (i32, i32) {
    %c0_i32 = arith.constant 0 : i32
    %c0_i32_0 = arith.constant 0 : i32
    return %arg0, %c0_i32 : i32, i32
  }
  func.func @transform_1(%arg0: i32) -> (i32, i32, i32) {
    %c0_i32 = arith.constant 0 : i32
    %c0_i32_0 = arith.constant 0 : i32
    %c0_i32_1 = arith.constant 0 : i32
    %c0_i32_2 = arith.constant 0 : i32
    return %c0_i32, %c0_i32_0, %c0_i32_1 : i32, i32, i32
  }
  func.func @transform_2(%arg0: i32) -> (i32, i32) {
    %c0_i32 = arith.constant 0 : i32
    %c0_i32_0 = arith.constant 0 : i32
    %c0_i32_1 = arith.constant 0 : i32
    return %c0_i32, %c0_i32_0 : i32, i32
  }
  func.func @transform_3(%arg0: i32) -> (i32, i32, i32) {
    %c0_i32 = arith.constant 0 : i32
    %c0_i32_0 = arith.constant 0 : i32
    %c0_i32_1 = arith.constant 0 : i32
    %c0_i32_2 = arith.constant 0 : i32
    return %c0_i32, %c0_i32_0, %c0_i32_1 : i32, i32, i32
  }
  func.func @transform_4(%arg0: i32) -> (i32, i32) {
    %c0_i32 = arith.constant 0 : i32
    %c0_i32_0 = arith.constant 0 : i32
    %c0_i32_1 = arith.constant 0 : i32
    return %c0_i32, %c0_i32_0 : i32, i32
  }
  func.func @transform_5(%arg0: i32) -> (i32, i32) {
    %c0_i32 = arith.constant 0 : i32
    %c0_i32_0 = arith.constant 0 : i32
    %c0_i32_1 = arith.constant 0 : i32
    return %c0_i32, %c0_i32_0 : i32, i32
  }
  func.func @transform_6(%arg0: i32) -> (i32, i32) {
    %c0_i32 = arith.constant 0 : i32
    %c0_i32_0 = arith.constant 0 : i32
    return %arg0, %c0_i32 : i32, i32
  }
}

</mosaic_0001>

<bundles_post_ra>
// kernel: tpu_custom_call.1
= control target key start
LH: loop header
LB: loop body
LE: loop exit
PB: predicated region body
PF: predicated region fallthrough
CT: control target
= control target key end

     0   :  { %s1233_s0 = inlined_call_operand.hbm [shape: f32[32,128], index: 0, kind: input, shape index: {}]   ;;  %s1234_s1 = inlined_call_operand.hbm [shape: f32[3,128,128], index: 1, kind: input, shape index: {}]   ;;  %s1235_s2 = inlined_call_operand.vmem [shape: f32[1,128], index: 2, kind: input, shape index: {}]   ;;  %s1236_s3 = inlined_call_operand.hbm [shape: f32[3,128,128], index: 3, kind: input, shape index: {}]   ;;  %s1237_s4 = inlined_call_operand.vmem [shape: f32[1,128], index: 4, kind: input, shape index: {}]   ;;  %s1238_s5 = inlined_call_operand.<no memory space> [shape: f32[1,1], index: 5, kind: input, shape index: {}]   ;;  %s1239_s6 = inlined_call_operand.hbm [shape: f32[32,128], index: 6, kind: output, shape index: {}]  }
   0x1   :  { %11 = sst [smem:[#allocation2]] %s1238_s5 }
   0x2   :  { %12 = vsyncpa [#allocation4], 0 }
   0x3   :  { %14 = vsyncpa [#allocation4 + $0x1], 0 }
   0x4   :  { %15 = vsyncpa [#allocation7], 0 }
   0x5   :  { %16 = vsyncpa [#allocation5], 0 }
   0x6   :  { %18 = vsyncpa [#allocation5 + $0x1], 0  ;;  %s1049_s23 = smov 0   ;;  %s1051_s24 = smov 0  }
   0x7   :  { %s1053_s25 = smov 0   ;;  %s1055_s26 = smov 0  }
   0x8 LB: > { %s1070_s5 = sadd.s32 4294967295, %s1003_s26   ;;  %s718_s27 = sadd.s32 4294967294, %s1003_s26   ;;  %s1003_s26 = sphi %s1055_s26, %s1251_s26   ;;  %s999_s25 = sphi %s1053_s25, %s1250_s25   ;;  %s995_s24 = sphi %s1051_s24, %s1249_s24   ;;  %s991_s23 = sphi %s1049_s23, %s1248_s23  }
   0x9   : > { %p44_p0 = scmp.ne.s32.totalorder %s995_s24, %s991_s23  ;;  %p45_p1 = scmp.eq.s32.totalorder %s1070_s5, 0 }
   0xa   : > { %p173_p2 = scmp.eq.s32.totalorder %s1070_s5, 1  ;;  %p179_p3 = scmp.eq.s32.totalorder %s718_s27, 1 }
   0xb   : > { %p1079_p4 = por %p45_p1, %p44_p0  ;;  %p719_p5 = scmp.ge.s32.totalorder %s1003_s26, 1 }
   0xc   : > { %p1084_p6 = por %p179_p3, %p44_p0  ;;  %p186_p7 = scmp.lt.s32.totalorder %s1003_s26, 3 }
   0xd   : > { %s197_s8 = sshll.u32 %s1234_s1, 4  ;;  %s1005_s10 = smov [#allocation6]   ;;  %s198_s8 = int_to_ptr.hbm [resolvable:$true] %s197_s8 }
   0xe   : > { %p1092_p8 = pnand %p719_p5, %p186_p7  ;;  %s199_s11 = sshll.u32 %s1005_s10, 4  ;;  %s200_s11 = int_to_ptr.vmem [resolvable:$true] %s199_s11 }
   0xf   : > { %s214_s14 = sshll.u32 %s1236_s3, 4  ;;  %s1240_s15 = smov 128   ;;  %s215_s14 = int_to_ptr.hbm [resolvable:$true] %s214_s14 }
  0x10   : > { %p782_p9 = pneg %p1092_p8  ;;  %s1007_s16 = smov 8  }
  0x11   : > { %s1008_s17 = smov [#allocation8]   ;;  %s1111_s19 = sadd.s32 1, %s1003_s26  }
  0x12   : > { %p783_p10 = pnand %p782_p9, %p45_p1  ;;  %s216_s18 = sshll.u32 %s1008_s17, 4  ;;  %s217_s18 = int_to_ptr.vmem [resolvable:$true] %s216_s18 }
  0x13   : > { %s31_s20 = sadd.s32 1, %s999_s25  ;;  %s28_s21 = ssub.s32 %s1003_s26, %s1111_s19 }
  0x14   : > { %785 = dma.hbm_to_vmem [thread:$0]  (!%p783_p10), %s198_s8, 6144, %s200_s11, [#allocation7], %s1240_s15, %s1240_s15, %s1007_s16  }
  0x15   : > { %788 = dma.hbm_to_vmem [thread:$0]  (!%p783_p10), %s215_s14, 6144, %s217_s18, [#allocation7], %s1240_s15, %s1240_s15, %s1007_s16  }
  0x16   : > { %p38_p12 = scmp.ne.s32.totalorder %s999_s25, %s995_s24  ;;  %p29_p13 = scmp.eq.s32.totalorder %s28_s21, 0 }
  0x17   : > { %p39_p0 = scmp.eq.s32.totalorder %s1003_s26, 0  ;;  %p799_p5 = scmp.lt.s32.totalorder %s1003_s26, 2 }
  0x18   : > { %p1121_p3 = por %p173_p2, %p38_p12  ;;  %s236_s30 = sand.u32 1, %s999_s25  }
  0x19   : > { %s1127_s27 = scalar_select %p29_p13, %s999_s25, %s31_s20  }
  0x1a   : > { %p40_p7 = por %p39_p0, %p38_p12  ;;  %s723_s7 = sshll.u32 %s236_s30, 4 }
  0x1b   : > { %s736_s8 = sshll.u32 %s1003_s26, 4  ;;  %s240_s13 = scalar_lea.vmem [#allocation3], %s723_s7 }
  0x1c   : > { %s245_s12 = scalar_lea.hbm %s1233_s0, %s736_s8  ;;  %s248_s14 = sshll.u32 %s240_s13, 4  ;;  %s249_s14 = int_to_ptr.vmem [resolvable:$true] %s248_s14 }
  0x1d   : > { %s246_s17 = sshll.u32 %s245_s12, 4  ;;  %p1134_p2 = pnand %p799_p5, %p40_p7  ;;  %s247_s17 = int_to_ptr.hbm [resolvable:$true] %s246_s17 }
  0x1e   : > { %s237_s20 = scalar_lea.sflag [#allocation4], %s236_s30  ;;  %s903_s21 = sshra.s32 %s247_s17, 4  ;;  %s904_s21 = int_to_ptr.hbm [resolvable:$true] %s903_s21 }
  0x1f   : > { %s905_s15 = scalar_lea.hbm %s904_s21, 16  ;;  %p907_p10 = pneg %p1134_p2 }
  0x20   : > { %p906_p9 = scmp.ne.s32.totalorder %s904_s21, %s905_s15  ;;  %s910_s10 = scalar_lea.hbm %s1233_s0, 32 }
  0x21   : > { %p911_p0 = scmp.lt.s32.totalorder %s904_s21, %s1233_s0  ;;  %p912_p5 = scmp.lt.s32.totalorder %s910_s10, %s905_s15 }
  0x22   : > { %p908_p12 = pnand %p907_p10, %p906_p9 }
  0x23   : > { %p913_p7 = por %p912_p5, %p911_p0 }
  0x24   : > { %p909_p13 = pneg %p908_p12 }
  0x26   : > { %p914_p11 = pnand %p913_p7, %p909_p13 }
  0x28   : > { %917 = shalt.err (!%p914_p11)
}
  0x29   : > { %s1246_s30 = smov 128   ;;  %260 = sbr.rel (%p1092_p8) target bundleno = 378 (0x17a), region = 44 }
  0x2a   : > { %792 = dma.hbm_to_vmem [thread:$0]  (!%p1134_p2), %s247_s17, 256, %s249_s14, %s237_s20, %s1246_s30, %s1246_s30, %s1007_s16  }
  0x2b   : > { %s1154_s13 = sand.u32 (!%p1092_p8), 1, %s995_s24  }
  0x2c   : > { %s727_s15 = sshll.u32 (!%p1092_p8), %s1154_s13, 4  ;;  %s263_s21 = scalar_lea.sflag (!%p1092_p8), [#allocation4], %s1154_s13 }
  0x2d   : > { %s1160_s8 = scalar_lea.vmem (!%p1092_p8), [#allocation3], %s727_s15 }
  0x2e   : > { %978 = dma.done.wait (%p1079_p4), %s263_s21, 256  }
  0x2f   : > { %980 = vsyncadd (%p1079_p4), %s263_s21, 4294967040 }
  0x30   : > { %982 = dma.done.wait (%p45_p1), [#allocation7], 12288  }
  0x31   : > { %984 = vsyncadd (%p45_p1), [#allocation7], 4294955008  ;;  %v424_v0 = vld [vmem:[#allocation6 + $0x178] sm:$0xff]  ;;  %v423_v1 = vld [vmem:[#allocation6 + $0x170] sm:$0xff]  ;;  %vm322_vm0 = vcmask 1046528   ;;  %vm315_vm1 = vcmask 1040384  }
  0x32   : > { %v361_v2 = vld [vmem:[#allocation6 + $0xf8] sm:$0xff]  ;;  %425 = vmatpush.msra.mxu2 %v424_v0  ;;  %v360_v4 = vld [vmem:[#allocation6 + $0xf0] sm:$0xff]  ;;  %v422_v5 = vld [vmem:[#allocation6 + $0x168] sm:$0xff]  ;;  %s310_s28 = sld [smem:[#allocation2]]  ;;  %s737_s18 = sshll.u32 %s1070_s5, 4 }
  0x33   : > { %362 = vmatpush.msra.mxu0 %v361_v2  ;;  %v344_v3 = vld [vmem:[#allocation6 + $0x78] sm:$0xff]  ;;  %v343_v6 = vld [vmem:[#allocation6 + $0x70] sm:$0xff]  ;;  %v359_v7 = vld [vmem:[#allocation6 + $0xe8] sm:$0xff]  ;;  %s305_s20 = scalar_lea.vmem [#allocation9], %s727_s15  ;;  %s622_s11 = scalar_lea.hbm %s1239_s6, %s737_s18 }
  0x34   : > { %385 = vmatpush.msra.mxu1 %v344_v3  ;;  %426 = vmatpush.msra.mxu2 %v423_v1  ;;  %v342_v8 = vld [vmem:[#allocation6 + $0x68] sm:$0xff]  ;;  %v421_v9 = vld [vmem:[#allocation6 + $0x160] sm:$0xff]  ;;  %v420_v12 = vld [vmem:[#allocation6 + $0x158] sm:$0xff]  ;;  %s623_s12 = sshll.u32 %s305_s20, 4  ;;  %s625_s30 = sshll.u32 %s622_s11, 4  ;;  %s624_s12 = int_to_ptr.vmem [resolvable:$true] %s623_s12  ;;  %s626_s30 = int_to_ptr.hbm [resolvable:$true] %s625_s30 }
  0x35   : > { %363 = vmatpush.msra.mxu0 %v360_v4  ;;  %v358_v10 = vld [vmem:[#allocation6 + $0xe0] sm:$0xff]  ;;  %v357_v13 = vld [vmem:[#allocation6 + $0xd8] sm:$0xff]  ;;  %v419_v15 = vld [vmem:[#allocation6 + $0x150] sm:$0xff]  ;;  %s611_s5 = scalar_lea.sflag [#allocation5], %s1154_s13  ;;  %s947_s15 = sshra.s32 %s626_s30, 4  ;;  %s948_s15 = int_to_ptr.hbm [resolvable:$true] %s947_s15 }
  0x36   : > { %386 = vmatpush.msra.mxu1 %v343_v6  ;;  %427 = vmatpush.msra.mxu2 %v422_v5  ;;  %v341_v11 = vld [vmem:[#allocation6 + $0x60] sm:$0xff]  ;;  %v340_v14 = vld [vmem:[#allocation6 + $0x58] sm:$0xff]  ;;  %v356_v16 = vld [vmem:[#allocation6 + $0xd0] sm:$0xff]  ;;  %s949_s21 = scalar_lea.hbm %s948_s15, 16  ;;  %s953_s9 = scalar_lea.hbm %s1239_s6, 32 }
  0x37   : > { %364 = vmatpush.msra.mxu0 %v359_v7  ;;  %v339_v17 = vld [vmem:[#allocation6 + $0x50] sm:$0xff]  ;;  %v418_v18 = vld [vmem:[#allocation6 + $0x148] sm:$0xff]  ;;  %v417_v21 = vld [vmem:[#allocation6 + $0x140] sm:$0xff]  ;;  %p950_p1 = scmp.ne.s32.totalorder %s948_s15, %s949_s21  ;;  %p954_p11 = scmp.lt.s32.totalorder %s948_s15, %s1239_s6 }
  0x38   : > { %387 = vmatpush.msra.mxu1 %v342_v8  ;;  %428 = vmatpush.msra.mxu2 %v421_v9  ;;  %v355_v19 = vld [vmem:[#allocation6 + $0xc8] sm:$0xff]  ;;  %v354_v22 = vld [vmem:[#allocation6 + $0xc0] sm:$0xff]  ;;  %v416_v24 = vld [vmem:[#allocation6 + $0x138] sm:$0xff]  ;;  %p955_p2 = scmp.lt.s32.totalorder %s953_s9, %s949_s21 }
  0x39   : > { %365 = vmatpush.msra.mxu0 %v358_v10  ;;  %v338_v20 = vld [vmem:[#allocation6 + $0x48] sm:$0xff]  ;;  %v337_v23 = vld [vmem:[#allocation6 + $0x40] sm:$0xff]  ;;  %v353_v25 = vld [vmem:[#allocation6 + $0xb8] sm:$0xff]  ;;  %p951_p4 = pnand %p950_p1, %p1121_p3 }
  0x3a   : > { %388 = vmatpush.msra.mxu1 %v341_v11  ;;  %429 = vmatpush.msra.mxu2 %v420_v12  ;;  %v336_v26 = vld [vmem:[#allocation6 + $0x38] sm:$0xff]  ;;  %v415_v27 = vld [vmem:[#allocation6 + $0x130] sm:$0xff]  ;;  %v414_v32 = vld [vmem:[#allocation6 + $0x128] sm:$0xff]  ;;  %p956_p9 = por %p955_p2, %p954_p11 }
  0x3b   : > { %366 = vmatpush.msra.mxu0 %v357_v13  ;;  %v352_v28 = vld [vmem:[#allocation6 + $0xb0] sm:$0xff]  ;;  %v511_v29 = vld [vmem:[#allocation8 + $0xf8] sm:$0xff]  ;;  %v351_v33 = vld [vmem:[#allocation6 + $0xa8] sm:$0xff]  ;;  %p952_p8 = pneg %p951_p4 }
  0x3c   : > { %389 = vmatpush.msra.mxu1 %v340_v14  ;;  %430 = vmatpush.msra.mxu2 %v419_v15  ;;  %v335_v30 = vld [vmem:[#allocation6 + $0x30] sm:$0xff]  ;;  %v334_v34 = vld [vmem:[#allocation6 + $0x28] sm:$0xff]  ;;  %v413_v36 = vld [vmem:[#allocation6 + $0x120] sm:$0xff] }
  0x3d   : > { %367 = vmatpush.msra.mxu0 %v356_v16  ;;  %v510_v31 = vld [vmem:[#allocation8 + $0xf0] sm:$0xff]  ;;  %512 = vmatpush.msra.mxu3 %v511_v29  ;;  %v509_v35 = vld [vmem:[#allocation8 + $0xe8] sm:$0xff]  ;;  %v350_v37 = vld [vmem:[#allocation6 + $0xa0] sm:$0xff]  ;;  %p957_p10 = pnand %p956_p9, %p952_p8 }
  0x3e   : > { %390 = vmatpush.msra.mxu1 %v339_v17  ;;  %431 = vmatpush.msra.mxu2 %v418_v18  ;;  %v412_v38 = vld [vmem:[#allocation6 + $0x118] sm:$0xff]  ;;  %v333_v39 = vld [vmem:[#allocation6 + $0x20] sm:$0xff]  ;;  %v411_v46 = vld [vmem:[#allocation6 + $0x110] sm:$0xff] }
  0x3f   : > { %368 = vmatpush.msra.mxu0 %v355_v19  ;;  %513 = vmatpush.msra.mxu3 %v510_v31  ;;  %v508_v40 = vld [vmem:[#allocation8 + $0xe0] sm:$0xff]  ;;  %v349_v41 = vld [vmem:[#allocation6 + $0x98] sm:$0xff]  ;;  %v348_v47 = vld [vmem:[#allocation6 + $0x90] sm:$0xff] }
  0x40   : > { %391 = vmatpush.msra.mxu1 %v338_v20  ;;  %432 = vmatpush.msra.mxu2 %v417_v21  ;;  %v1171_v42 = vld [vmem:[%s1160_s8] sm:$0xff]  ;;  %v1174_v43 = vld [vmem:[%s1160_s8 + $0x8] sm:$0xff] }
  0x41   : > { %369 = vmatpush.msra.mxu0 %v354_v22  ;;  %514 = vmatpush.msra.mxu3 %v509_v35  ;;  %v332_v44 = vld [vmem:[#allocation6 + $0x18] sm:$0xff]  ;;  %v331_v48 = vld [vmem:[#allocation6 + $0x10] sm:$0xff]  ;;  %v312_v49 = vrot.slane %v1171_v42, 1  ;;  %v323_v50 = vrot.slane %v1174_v43, 1  ;;  %v410_v52 = vld [vmem:[#allocation6 + $0x108] sm:$0xff]  ;;  %v316_v54 = vrot.slane %v1171_v42, 7 }
  0x42   : > { %392 = vmatpush.msra.mxu1 %v337_v23  ;;  %433 = vmatpush.msra.mxu2 %v416_v24  ;;  %v507_v45 = vld [vmem:[#allocation8 + $0xd8] sm:$0xff]  ;;  %v506_v51 = vld [vmem:[#allocation8 + $0xd0] sm:$0xff]  ;;  %v347_v53 = vld [vmem:[#allocation6 + $0x88] sm:$0xff]  ;;  %v317_v1 = vrot.slane %v1174_v43, 7 }
  0x43   : > { %370 = vmatpush.msra.mxu0 %v353_v25  ;;  %515 = vmatpush.msra.mxu3 %v508_v40  ;;  %v330_v55 = vld [vmem:[#allocation6 + $0x8] sm:$0xff]  ;;  %v409_v57 = vld [vmem:[#allocation6 + $0x100] sm:$0xff]  ;;  %v324_v59 = vsel %vm322_vm0, %v312_v49, %v323_v50  ;;  %v321_v61 = vsel %vm315_vm1, %v312_v49, %v316_v54  ;;  %v494_v63 = vld [vmem:[#allocation8 + $0x78] sm:$0xff] }
  0x44   : > { %393 = vmatpush.msra.mxu1 %v336_v26  ;;  %434 = vmatpush.msra.mxu2 %v415_v27  ;;  %v505_v56 = vld [vmem:[#allocation8 + $0xc8] sm:$0xff]  ;;  %v346_v58 = vld [vmem:[#allocation6 + $0x80] sm:$0xff]  ;;  %v574_v0 = vld [vmem:[#allocation8 + $0x178] sm:$0xff]  ;;  %v328_v8 = vsel %vm322_vm0, %v323_v50, %v317_v1  ;;  %v318_v10 = vsel %vm315_vm1, %v316_v54, %v317_v1  ;;  %v458_v50 = vstv %s310_s28 }
  0x45   : > { %371 = vmatpush.msra.mxu0 %v352_v28  ;;  %516 = vmatpush.msra.mxu3 %v507_v45  ;;  %v329_v60 = vld [vmem:[#allocation6] sm:$0xff]  ;;  %v503_v2 = vld [vmem:[#allocation8 + $0xb8] sm:$0xff]  ;;  %v493_v3 = vld [vmem:[#allocation8 + $0x70] sm:$0xff] }
  0x46   : > { %394 = vmatpush.msra.mxu1 %v335_v30  ;;  %435 = vmatpush.msra.mxu2 %v414_v32  ;;  %v504_v62 = vld [vmem:[#allocation8 + $0xc0] sm:$0xff]  ;;  %v573_v4 = vld [vmem:[#allocation8 + $0x170] sm:$0xff]  ;;  %v492_v6 = vld [vmem:[#allocation8 + $0x68] sm:$0xff] }
  0x47   : > { %372 = vmatpush.msra.mxu0 %v351_v33  ;;  %517 = vmatpush.msra.mxu3 %v506_v51  ;;  %v502_v5 = vld [vmem:[#allocation8 + $0xb0] sm:$0xff]  ;;  %v572_v7 = vld [vmem:[#allocation8 + $0x168] sm:$0xff]  ;;  %v500_v11 = vld [vmem:[#allocation8 + $0xa0] sm:$0xff] }
  0x48   : > { %395 = vmatpush.msra.mxu1 %v334_v34  ;;  %436 = vmatpush.msra.mxu2 %v413_v36  ;;  %v501_v9 = vld [vmem:[#allocation8 + $0xa8] sm:$0xff]  ;;  %v491_v12 = vld [vmem:[#allocation8 + $0x60] sm:$0xff]  ;;  %v499_v14 = vld [vmem:[#allocation8 + $0x98] sm:$0xff] }
  0x49   : > { %373 = vmatpush.msra.mxu0 %v350_v37  ;;  %518 = vmatpush.msra.mxu3 %v505_v56  ;;  %v571_v13 = vld [vmem:[#allocation8 + $0x160] sm:$0xff]  ;;  %v490_v15 = vld [vmem:[#allocation8 + $0x58] sm:$0xff]  ;;  %v498_v17 = vld [vmem:[#allocation8 + $0x90] sm:$0xff] }
  0x4a   : > { %396 = vmatpush.msra.mxu1 %v333_v39  ;;  %437 = vmatpush.msra.mxu2 %v412_v38  ;;  %v570_v16 = vld [vmem:[#allocation8 + $0x158] sm:$0xff]  ;;  %v489_v18 = vld [vmem:[#allocation8 + $0x50] sm:$0xff]  ;;  %v497_v19 = vld [vmem:[#allocation8 + $0x88] sm:$0xff] }
  0x4b   : > { %374 = vmatpush.msra.mxu0 %v349_v41  ;;  %519 = vmatpush.msra.mxu3 %v504_v62  ;;  %v488_v20 = vld [vmem:[#allocation8 + $0x48] sm:$0xff]  ;;  %v496_v21 = vld [vmem:[#allocation8 + $0x80] sm:$0xff]  ;;  %v486_v23 = vld [vmem:[#allocation8 + $0x38] sm:$0xff] }
  0x4c   : > { %397 = vmatpush.msra.mxu1 %v332_v44  ;;  %438 = vmatpush.msra.mxu2 %v411_v46  ;;  %v487_v22 = vld [vmem:[#allocation8 + $0x40] sm:$0xff]  ;;  %v485_v24 = vld [vmem:[#allocation8 + $0x30] sm:$0xff]  ;;  %v484_v26 = vld [vmem:[#allocation8 + $0x28] sm:$0xff] }
  0x4d   : > { %375 = vmatpush.msra.mxu0 %v348_v47  ;;  %520 = vmatpush.msra.mxu3 %v503_v2  ;;  %v569_v25 = vld [vmem:[#allocation8 + $0x150] sm:$0xff]  ;;  %v568_v27 = vld [vmem:[#allocation8 + $0x148] sm:$0xff]  ;;  %v483_v28 = vld [vmem:[#allocation8 + $0x20] sm:$0xff] }
  0x4e   : > { %398 = vmatpush.msra.mxu1 %v331_v48  ;;  %439 = vmatpush.msra.mxu2 %v410_v52  ;;  %v567_v29 = vld [vmem:[#allocation8 + $0x140] sm:$0xff]  ;;  %v482_v30 = vld [vmem:[#allocation8 + $0x18] sm:$0xff]  ;;  %v481_v32 = vld [vmem:[#allocation8 + $0x10] sm:$0xff] }
  0x4f   : > { %376 = vmatpush.msra.mxu0 %v347_v53  ;;  %521 = vmatpush.msra.mxu3 %v502_v5  ;;  %v566_v31 = vld [vmem:[#allocation8 + $0x138] sm:$0xff]  ;;  %v565_v33 = vld [vmem:[#allocation8 + $0x130] sm:$0xff]  ;;  %v480_v34 = vld [vmem:[#allocation8 + $0x8] sm:$0xff] }
  0x50   : > { %399 = vmatpush.msra.mxu1 %v330_v55  ;;  %440 = vmatpush.msra.mxu2 %v409_v57  ;;  %v564_v35 = vld [vmem:[#allocation8 + $0x128] sm:$0xff]  ;;  %v479_v36 = vld [vmem:[#allocation8] sm:$0xff]  ;;  %v562_v38 = vld [vmem:[#allocation8 + $0x118] sm:$0xff] }
  0x51   : > { %377 = vmatpush.msra.mxu0 %v346_v58  ;;  %441 = vmatmul.f32.vlgmr.msra.gmra.mxu2 %v324_v59  ;;  %v563_v37 = vld [vmem:[#allocation8 + $0x120] sm:$0xff]  ;;  %v561_v39 = vld [vmem:[#allocation8 + $0x110] sm:$0xff]  ;;  %v560_v40 = vld [vmem:[#allocation8 + $0x108] sm:$0xff] }
  0x52   : > { %400 = vmatpush.msra.mxu1 %v329_v60  ;;  %378 = vmatmul.f32.vlgmr.msra.gmra.mxu0 %v1171_v42  ;;  %v559_v41 = vld [vmem:[#allocation8 + $0x100] sm:$0xff] }
  0x53   : > { %401 = vmatmul.f32.vlgmr.msra.gmra.mxu1 %v321_v61  ;;  %535 = vmatpush.msrb.mxu0 %v494_v63  ;;  %v841_v47 = vld [vmem:[%s1235_s2] ss:$0 sm:$0xff] }
  0x54   : > { %738 = vmatpush.msrb.mxu2 %v494_v63  ;;  %575 = vmatpush.msrb.mxu1 %v574_v0 }
  0x55   : > { %536 = vmatpush.msrb.mxu0 %v493_v3  ;;  %522 = vmatpush.msra.mxu3 %v501_v9  ;;  %v842_v9 = vld [vmem:[%s1237_s4] ss:$0 sm:$0xff] }
  0x56   : > { %739 = vmatpush.msrb.mxu2 %v493_v3  ;;  %576 = vmatpush.msrb.mxu1 %v573_v4 }
  0x57   : > { %537 = vmatpush.msrb.mxu0 %v492_v6  ;;  %523 = vmatpush.msra.mxu3 %v500_v11 }
  0x58   : > { %740 = vmatpush.msrb.mxu2 %v492_v6  ;;  %577 = vmatpush.msrb.mxu1 %v572_v7 }
  0x59   : > { %444 = vmatmul.f32.gmra.mxu2 %v328_v8  ;;  %538 = vmatpush.msrb.mxu0 %v491_v12 }
  0x5a   : > { %381 = vmatmul.f32.gmra.mxu0 %v1174_v43  ;;  %741 = vmatpush.msrb.mxu2 %v491_v12 }
  0x5b   : > { %404 = vmatmul.f32.gmra.mxu1 %v318_v10  ;;  %524 = vmatpush.msra.mxu3 %v499_v14 }
  0x5c   : > { %578 = vmatpush.msrb.mxu1 %v571_v13  ;;  %539 = vmatpush.msrb.mxu0 %v490_v15 }
  0x5d   : > { %742 = vmatpush.msrb.mxu2 %v490_v15  ;;  %525 = vmatpush.msra.mxu3 %v498_v17 }
  0x5e   : > { %579 = vmatpush.msrb.mxu1 %v570_v16  ;;  %540 = vmatpush.msrb.mxu0 %v489_v18 }
  0x5f   : > { %743 = vmatpush.msrb.mxu2 %v489_v18  ;;  %526 = vmatpush.msra.mxu3 %v497_v19 }
  0x60   : > { %541 = vmatpush.msrb.mxu0 %v488_v20  ;;  %580 = vmatpush.msrb.mxu1 %v569_v25 }
  0x61   : > { %744 = vmatpush.msrb.mxu2 %v488_v20  ;;  %527 = vmatpush.msra.mxu3 %v496_v21 }
  0x62   : > { %542 = vmatpush.msrb.mxu0 %v487_v22  ;;  %581 = vmatpush.msrb.mxu1 %v568_v27 }
  0x63   : > { %754 = vmatpush.msrb.mxu3 %v574_v0  ;;  %745 = vmatpush.msrb.mxu2 %v487_v22 }
  0x64   : > { %543 = vmatpush.msrb.mxu0 %v486_v23  ;;  %582 = vmatpush.msrb.mxu1 %v567_v29 }
  0x65   : > { %755 = vmatpush.msrb.mxu3 %v573_v4  ;;  %746 = vmatpush.msrb.mxu2 %v486_v23 }
  0x66   : > { %544 = vmatpush.msrb.mxu0 %v485_v24  ;;  %583 = vmatpush.msrb.mxu1 %v566_v31 }
  0x67   : > { %756 = vmatpush.msrb.mxu3 %v572_v7  ;;  %747 = vmatpush.msrb.mxu2 %v485_v24 }
  0x68   : > { %545 = vmatpush.msrb.mxu0 %v484_v26  ;;  %584 = vmatpush.msrb.mxu1 %v565_v33 }
  0x69   : > { %757 = vmatpush.msrb.mxu3 %v571_v13  ;;  %748 = vmatpush.msrb.mxu2 %v484_v26 }
  0x6a   : > { %546 = vmatpush.msrb.mxu0 %v483_v28  ;;  %585 = vmatpush.msrb.mxu1 %v564_v35 }
  0x6b   : > { %758 = vmatpush.msrb.mxu3 %v570_v16  ;;  %749 = vmatpush.msrb.mxu2 %v483_v28 }
  0x6c   : > { %547 = vmatpush.msrb.mxu0 %v482_v30  ;;  %586 = vmatpush.msrb.mxu1 %v563_v37 }
  0x6d   : > { %759 = vmatpush.msrb.mxu3 %v569_v25  ;;  %750 = vmatpush.msrb.mxu2 %v482_v30 }
  0x6e   : > { %548 = vmatpush.msrb.mxu0 %v481_v32  ;;  %587 = vmatpush.msrb.mxu1 %v562_v38 }
  0x6f   : > { %760 = vmatpush.msrb.mxu3 %v568_v27  ;;  %751 = vmatpush.msrb.mxu2 %v481_v32 }
  0x70   : > { %549 = vmatpush.msrb.mxu0 %v480_v34  ;;  %588 = vmatpush.msrb.mxu1 %v561_v39 }
  0x71   : > { %761 = vmatpush.msrb.mxu3 %v567_v29  ;;  %752 = vmatpush.msrb.mxu2 %v480_v34 }
  0x72   : > { %550 = vmatpush.msrb.mxu0 %v479_v36  ;;  %589 = vmatpush.msrb.mxu1 %v560_v40 }
  0x73   : > { %762 = vmatpush.msrb.mxu3 %v566_v31  ;;  %753 = vmatpush.msrb.mxu2 %v479_v36 }
  0x74   : > { %590 = vmatpush.msrb.mxu1 %v559_v41 }
  0x75   : > { %763 = vmatpush.msrb.mxu3 %v565_v33 }
  0x77   : > { %764 = vmatpush.msrb.mxu3 %v564_v35 }
  0x79   : > { %765 = vmatpush.msrb.mxu3 %v563_v37 }
  0x7b   : > { %766 = vmatpush.msrb.mxu3 %v562_v38 }
  0x7d   : > { %767 = vmatpush.msrb.mxu3 %v561_v39 }
  0x7f   : > { %768 = vmatpush.msrb.mxu3 %v560_v40 }
  0x81   : > { %769 = vmatpush.msrb.mxu3 %v559_v41 }
  0xcf   : > { %v379_v44 = vpop.f32.mrf.mxu0 }
  0xd0   : > { %v402_v45 = vpop.f32.mrf.mxu1 }
  0xd1   : > { %v403_v46 = vadd.f32 %v402_v45, %v379_v44 }
  0xd4   : > { %v442_v48 = vpop.f32.mrf.mxu2 }
  0xd5   : > { %v448_v49 = vadd.f32 %v442_v48, %v403_v46 }
  0xd7   : > { %v454_v51 = vadd.f32 %v841_v47, %v448_v49  ;;  %v382_v52 = vpop.f32.mrf.mxu0 }
  0xd8   : > { %v405_v53 = vpop.f32.mrf.mxu1 }
  0xd9   : > { %v406_v54 = vadd.f32 %v405_v53, %v382_v52  ;;  %vm456_vm2 = vcmp.ge.f32.partialorder %v454_v51, 0.0  ;;  %v459_v55 = vmul.f32 %v458_v50, %v454_v51 }
  0xdb   : > { %v461_v56 = vsel %vm456_vm2, %v454_v51, %v459_v55 }
  0xdc   : > { %v445_v57 = vpop.f32.mrf.mxu2  ;;  %v464_v58 = vrot.slane %v461_v56, 1  ;;  %v467_v59 = vrot.slane %v461_v56, 7  ;;  %528 = vmatmul.f32.vlgmr.msra.gmra.mxu3 %v461_v56 }
  0xdd   : > { %v449_v60 = vadd.f32 %v445_v57, %v406_v54 }
  0xde   : > { %v472_v61 = vsel %vm315_vm1, %v464_v58, %v467_v59 }
  0xdf   : > { %v455_v62 = vadd.f32 %v841_v47, %v449_v60  ;;  %551 = vmatmul.f32.vlgmr.msrb.gmra.mxu0 %v472_v61 }
  0xe1   : > { %vm457_vm3 = vcmp.ge.f32.partialorder %v455_v62, 0.0  ;;  %v460_v63 = vmul.f32 %v458_v50, %v455_v62 }
  0xe3   : > { %v462_v0 = vsel %vm457_vm3, %v455_v62, %v460_v63 }
  0xe4   : > { %v468_v1 = vrot.slane %v462_v0, 7  ;;  %v473_v2 = vrot.slane %v462_v0, 1  ;;  %531 = vmatmul.f32.gmra.mxu3 %v462_v0 }
  0xe6   : > { %v469_v3 = vsel %vm315_vm1, %v467_v59, %v468_v1  ;;  %v474_v4 = vsel %vm322_vm0, %v464_v58, %v473_v2  ;;  %v478_v5 = vsel %vm322_vm0, %v473_v2, %v468_v1 }
  0xe7   : > { %554 = vmatmul.f32.vlgmr.msrb.gmra.mxu2 %v469_v3  ;;  %591 = vmatmul.f32.vlgmr.msrb.gmra.mxu1 %v474_v4 }
  0xec   : > { %594 = vmatmul.f32.vlgmr.msrb.gmra.mxu3 %v478_v5 }
 0x15c   : > { %v552_v7 = vpop.f32.mrf.mxu0 }
 0x15f   : > { %v529_v6 = vpop.f32.mrf.mxu3 }
 0x160   : > { %v553_v8 = vadd.f32 %v552_v7, %v529_v6 }
 0x164   : > { %v592_v10 = vpop.f32.mrf.mxu1 }
 0x165   : > { %v598_v11 = vadd.f32 %v592_v10, %v553_v8 }
 0x167   : > { %v604_v12 = vadd.f32 %v842_v9, %v598_v11  ;;  %v532_v13 = vpop.f32.mrf.mxu3 }
 0x169   : > { %v606_v14 = vadd.f32 %v604_v12, %v1171_v42 }
 0x16a   : > { %v555_v15 = vpop.f32.mrf.mxu2 }
 0x16b   : > { %608 = vst [vmem:[%s305_s20] sm:$0xff] %v606_v14  ;;  %v556_v16 = vadd.f32 %v555_v15, %v532_v13 }
 0x16f   : > { %v595_v17 = vpop.f32.mrf.mxu3 }
 0x170   : > { %v599_v18 = vadd.f32 %v595_v17, %v556_v16 }
 0x172   : > { %v605_v19 = vadd.f32 %v842_v9, %v599_v18 }
 0x174   : > { %v607_v42 = vadd.f32 %v605_v19, %v1174_v43 }
 0x176   : > { %609 = vst [vmem:[%s305_s20 + $0x8] sm:$0xff] %v607_v42 }
 0x177   : > { %960 = shalt.err (!%p957_p10)
}
 0x178   : > { %s1009_s13 = smov 128   ;;  %s1010_s17 = smov 8  }
 0x179   : > { %780 = dma.vmem_to_hbm [thread:$0]  (%p1121_p3), %s624_s12, 256, %s626_s30, %s611_s5, %s1009_s13, %s1009_s13, %s1010_s17  }
 0x17a PF: > { %s640_s18 = sand.u32 1, %s991_s23   ;;  %p1247_p12 = scmp.ge.s32.totalorder %s1003_s26, 2 }
 0x17b   : > { %s641_s20 = scalar_lea.sflag [#allocation5], %s640_s18 }
 0x17c   : > { %p794_p13 = pnand %p1247_p12, %p1084_p6 }
 0x17e   : > { %p795_p0 = pneg %p794_p13 }
 0x180   : > { %986 = dma.done.wait (%p795_p0), %s641_s20, 256  }
 0x181   : > { %988 = vsyncadd (%p795_p0), %s641_s20, 4294967040  ;;  %p21_p5 = scmp.ge.s32.totalorder %s1111_s19, 4   ;;  %s1248_s23 = smov %s995_s24 }
 0x182   : > { %s1249_s24 = smov %s999_s25  ;;  %s1250_s25 = smov %s1127_s27 }
 0x183   : > { %s1251_s26 = smov %s1111_s19  ;;  %23 = sbr.rel (!%p21_p5) target bundleno = 8 (0x8), region = 101 }
 0x188   :  { %647 = vsyncpa [#allocation4], 1 }
 0x189   :  { %649 = vsyncpa [#allocation4 + $0x1], 1 }
 0x18a   :  { %650 = vsyncpa [#allocation7], 1 }
 0x18b   :  { %651 = vsyncpa [#allocation5], 1 }
 0x18c   :  { %653 = vsyncpa [#allocation5 + $0x1], 1 }

</bundles_post_ra>
